<compile_context>
chip_gen: v7x
topology: tpu7x:2x2x1
jax: 0.10.0
libtpu: 0.0.40
codegen_flags: <defaults>
</compile_context>

<pallas_src>
import functools

import jax
import jax.numpy as jnp
from jax.experimental import pallas as pl
from jax.experimental.pallas import tpu as pltpu


def _round_up(x, m):
    return ((x + m - 1) // m) * m


def _celoss_ls_kernel(logits_ref, target_ref, loss_ref, valid_ref,
                      *, ls_factor, ignore_index, num_classes):
    x = logits_ref[...].astype(jnp.float32)            # (TN, C)
    t = target_ref[...]                                 # (TN, 1) int32

    # Numerically-stable pieces of log-softmax (no full (TN,C) log_softmax tile).
    m = jnp.max(x, axis=-1, keepdims=True)               # (TN, 1)
    z = x - m                                            # (TN, C)
    lse = jnp.log(jnp.sum(jnp.exp(z), axis=-1, keepdims=True))   # (TN, 1)

    # z at the target class via an iota compare (ignore_index rows match nothing).
    cls_ids = jax.lax.broadcasted_iota(jnp.int32, x.shape, dimension=1)
    z_t = jnp.sum(jnp.where(cls_ids == t, z, 0.0), axis=-1, keepdims=True)  # (TN, 1)
    z_sum = jnp.sum(z, axis=-1, keepdims=True)                              # (TN, 1)

    complement = 1.0 - ls_factor
    # -sum((z - lse) * smooth) with sum(smooth) == 1:
    per_row = lse - (complement * z_t + (ls_factor / num_classes) * z_sum)  # (TN, 1)
    valid = (t != ignore_index).astype(jnp.float32)                         # (TN, 1)

    loss_ref[...] = per_row * valid
    valid_ref[...] = valid


def celoss_with_ls(logits, target, *, ls_factor=0.1, ignore_index=-1, tile_n=None):
    """Mean label-smoothed cross-entropy over rows with target != ignore_index."""
    n, c = logits.shape
    itemsize = jnp.dtype(logits.dtype).itemsize

    if tile_n is None:
        # ~4 MiB per logits block (Pallas double-buffers it), capped at 1024 rows.
        budget = 4 * 1024 * 1024
        tile_n = max(8, min(1024, budget // max(c * itemsize, 1)))
    tile_n = max(8, (int(tile_n) // 8) * 8)
    # Don't pick a tile bigger than the (8-rounded) problem.
    tile_n = min(tile_n, _round_up(n, 8))

    n_pad = _round_up(n, tile_n)
    if n_pad != n:
        logits = jnp.pad(logits, ((0, n_pad - n), (0, 0)))
        target = jnp.pad(target, (0, n_pad - n), constant_values=ignore_index)
    target2d = target.astype(jnp.int32).reshape(n_pad, 1)

    kernel = functools.partial(
        _celoss_ls_kernel,
        ls_factor=float(ls_factor),
        ignore_index=int(ignore_index),
        num_classes=c,
    )

    per_row_loss, per_row_valid = pl.pallas_call(
        kernel,
        out_shape=(
            jax.ShapeDtypeStruct((n_pad, 1), jnp.float32),
            jax.ShapeDtypeStruct((n_pad, 1), jnp.float32),
        ),
        grid_spec=pltpu.PrefetchScalarGridSpec(
            num_scalar_prefetch=0,
            grid=(n_pad // tile_n,),
            in_specs=[
                pl.BlockSpec((tile_n, c), lambda i: (i, 0)),   # logits tile
                pl.BlockSpec((tile_n, 1), lambda i: (i, 0)),   # target tile
            ],
            out_specs=[
                pl.BlockSpec((tile_n, 1), lambda i: (i, 0)),   # masked per-row loss
                pl.BlockSpec((tile_n, 1), lambda i: (i, 0)),   # per-row validity
            ],
        ),
        compiler_params=pltpu.CompilerParams(
            dimension_semantics=("parallel",),                 # rows are independent
            vmem_limit_bytes=32 * 1024 * 1024,
        ),
        cost_estimate=pl.CostEstimate(
            flops=5 * n_pad * c,
            transcendentals=n_pad * c,
            bytes_accessed=n_pad * c * itemsize + 3 * n_pad * 4,
        ),
    )(logits, target2d)

    # Tiny epilogue (ordinary XLA ops): mean over valid rows.
    return jnp.sum(per_row_loss) / jnp.sum(per_row_valid)


def _reference(logits, target, *, ls_factor=0.1, ignore_index=-1):
    """Pure-JAX reference mirroring the PyTorch module semantics."""
    c = logits.shape[-1]
    mask = target != ignore_index
    oh = jax.nn.one_hot(jnp.where(mask, target, 0), c, dtype=jnp.float32)
    oh = jnp.where(mask[:, None], oh, 0.0)
    smooth = oh * (1.0 - ls_factor) + ls_factor / c
    logs = jax.nn.log_softmax(logits.astype(jnp.float32), axis=1)
    per_row = -jnp.sum(logs * smooth, axis=1)
    return jnp.sum(per_row * mask.astype(jnp.float32)) / jnp.sum(mask.astype(jnp.float32))


if __name__ == "__main__":
    CLASSES = 16
    LS_FACTOR = 0.1
    IGNORE_INDEX = -1

    key = jax.random.PRNGKey(0)
    k1, k2, k3, k4 = jax.random.split(key, 4)

    # Case 1: tiny single-tile problem (auto tile_n).
    n1 = 16
    logits1 = jax.random.normal(k1, (n1, CLASSES), dtype=jnp.float32) * 2.0
    target1 = jax.random.randint(k2, (n1,), 0, CLASSES, dtype=jnp.int32)
    target1 = target1.at[3].set(IGNORE_INDEX).at[10].set(IGNORE_INDEX)

    loss1 = jax.block_until_ready(
        celoss_with_ls(logits1, target1, ls_factor=LS_FACTOR, ignore_index=IGNORE_INDEX))
    ref1 = _reference(logits1, target1, ls_factor=LS_FACTOR, ignore_index=IGNORE_INDEX)
    assert jnp.allclose(loss1, ref1, rtol=1e-5, atol=1e-5), (loss1, ref1)

    # Case 2: ragged row count + multi-tile grid (explicit small tile exercises
    # row padding and the parallel grid axis).
    n2 = 200
    logits2 = jax.random.normal(k3, (n2, CLASSES), dtype=jnp.float32) * 2.0
    target2 = jax.random.randint(k4, (n2,), 0, CLASSES, dtype=jnp.int32)
    target2 = (target2.at[7].set(IGNORE_INDEX)
                       .at[100].set(IGNORE_INDEX)
                       .at[199].set(IGNORE_INDEX))

    loss2 = jax.block_until_ready(
        celoss_with_ls(logits2, target2, ls_factor=LS_FACTOR,
                       ignore_index=IGNORE_INDEX, tile_n=64))
    ref2 = _reference(logits2, target2, ls_factor=LS_FACTOR, ignore_index=IGNORE_INDEX)
    assert jnp.allclose(loss2, ref2, rtol=1e-5, atol=1e-5), (loss2, ref2)

    print("KERNEL_OK")
</pallas_src>

<mosaic_0001>
module attributes {stable_mosaic.version = 11 : i64} {
  func.func @_celoss_ls_kernel(%arg0: i32, %arg1: memref<16x16xf32, #tpu.memory_space<vmem>>, %arg2: memref<16x1xi32, #tpu.memory_space<vmem>>, %arg3: memref<16x1xf32, #tpu.memory_space<vmem>>, %arg4: memref<16x1xf32, #tpu.memory_space<vmem>>) attributes {dimension_semantics = [#tpu.dimension_semantics<parallel>], iteration_bounds = array<i64: 1>, scalar_prefetch = 0 : i64, scratch_operands = 0 : i64, tpu.core_type = #tpu.core_type<tc>, window_params = [{transform_indices = @transform_0, window_bounds = array<i64: 16, 16>}, {transform_indices = @transform_1, window_bounds = array<i64: 16, 1>}, {transform_indices = @transform_2, window_bounds = array<i64: 16, 1>}, {transform_indices = @transform_3, window_bounds = array<i64: 16, 1>}]} {
    %c0 = arith.constant 0 : index
    %c0_0 = arith.constant 0 : index
    %0 = vector.load %arg1[%c0, %c0_0] : memref<16x16xf32, #tpu.memory_space<vmem>>, vector<16x16xf32>
    %c0_1 = arith.constant 0 : index
    %c0_2 = arith.constant 0 : index
    %1 = vector.load %arg2[%c0_1, %c0_2] : memref<16x1xi32, #tpu.memory_space<vmem>>, vector<16x1xi32>
    %cst = arith.constant dense<0xFF800000> : vector<16xf32>
    %2 = vector.multi_reduction <maximumf>, %0, %cst [1] : vector<16x16xf32> to vector<16xf32>
    %3 = vector.shape_cast %2 : vector<16xf32> to vector<16x1xf32>
    %4 = vector.broadcast %3 : vector<16x1xf32> to vector<16x16xf32>
    %5 = arith.subf %0, %4 : vector<16x16xf32>
    %6 = math.exp %5 : vector<16x16xf32>
    %cst_3 = arith.constant dense<0.000000e+00> : vector<16xf32>
    %7 = vector.multi_reduction <add>, %6, %cst_3 [1] : vector<16x16xf32> to vector<16xf32>
    %8 = vector.shape_cast %7 : vector<16xf32> to vector<16x1xf32>
    %9 = math.log %8 : vector<16x1xf32>
    %10 = tpu.iota {dimensions = array<i32: 1>} : vector<16x16xi32>
    %11 = vector.broadcast %1 : vector<16x1xi32> to vector<16x16xi32>
    %12 = arith.cmpi eq, %10, %11 : vector<16x16xi32>
    %cst_4 = arith.constant 0.000000e+00 : f32
    %13 = vector.broadcast %cst_4 : f32 to vector<16x16xf32>
    %14 = arith.select %12, %5, %13 : vector<16x16xi1>, vector<16x16xf32>
    %cst_5 = arith.constant dense<0.000000e+00> : vector<16xf32>
    %15 = vector.multi_reduction <add>, %14, %cst_5 [1] : vector<16x16xf32> to vector<16xf32>
    %16 = vector.shape_cast %15 : vector<16xf32> to vector<16x1xf32>
    %cst_6 = arith.constant dense<0.000000e+00> : vector<16xf32>
    %17 = vector.multi_reduction <add>, %5, %cst_6 [1] : vector<16x16xf32> to vector<16xf32>
    %18 = vector.shape_cast %17 : vector<16xf32> to vector<16x1xf32>
    %cst_7 = arith.constant 0.899999976 : f32
    %19 = vector.broadcast %cst_7 : f32 to vector<16x1xf32>
    %20 = arith.mulf %19, %16 : vector<16x1xf32>
    %cst_8 = arith.constant 6.250000e-03 : f32
    %21 = vector.broadcast %cst_8 : f32 to vector<16x1xf32>
    %22 = arith.mulf %21, %18 : vector<16x1xf32>
    %23 = arith.addf %20, %22 : vector<16x1xf32>
    %24 = arith.subf %9, %23 : vector<16x1xf32>
    %c-1_i32 = arith.constant -1 : i32
    %25 = vector.broadcast %c-1_i32 : i32 to vector<16x1xi32>
    %26 = arith.cmpi ne, %1, %25 : vector<16x1xi32>
    %27 = arith.extui %26 : vector<16x1xi1> to vector<16x1xi32>
    %28 = arith.sitofp %27 : vector<16x1xi32> to vector<16x1xf32>
    %29 = arith.mulf %24, %28 : vector<16x1xf32>
    %c0_9 = arith.constant 0 : index
    %c0_10 = arith.constant 0 : index
    %30 = vector.load %arg3[%c0_9, %c0_10] : memref<16x1xf32, #tpu.memory_space<vmem>>, vector<16x1xf32>
    tpu.vector_store %arg3[%c0_9, %c0_10], %29 {strides = array<i32>} : memref<16x1xf32, #tpu.memory_space<vmem>>, vector<16x1xf32>,
    %c0_11 = arith.constant 0 : index
    %c0_12 = arith.constant 0 : index
    %31 = vector.load %arg4[%c0_11, %c0_12] : memref<16x1xf32, #tpu.memory_space<vmem>>, vector<16x1xf32>
    tpu.vector_store %arg4[%c0_11, %c0_12], %28 {strides = array<i32>} : memref<16x1xf32, #tpu.memory_space<vmem>>, vector<16x1xf32>,
    return
  }
  func.func @transform_0(%arg0: i32) -> (i32, i32) {
    %c0_i32 = arith.constant 0 : i32
    %c0_i32_0 = arith.constant 0 : i32
    return %arg0, %c0_i32 : i32, i32
  }
  func.func @transform_1(%arg0: i32) -> (i32, i32) {
    %c0_i32 = arith.constant 0 : i32
    %c0_i32_0 = arith.constant 0 : i32
    return %arg0, %c0_i32 : i32, i32
  }
  func.func @transform_2(%arg0: i32) -> (i32, i32) {
    %c0_i32 = arith.constant 0 : i32
    %c0_i32_0 = arith.constant 0 : i32
    return %arg0, %c0_i32 : i32, i32
  }
  func.func @transform_3(%arg0: i32) -> (i32, i32) {
    %c0_i32 = arith.constant 0 : i32
    %c0_i32_0 = arith.constant 0 : i32
    return %arg0, %c0_i32 : i32, i32
  }
}

</mosaic_0001>

<bundles_post_ra>
// kernel: tpu_custom_call.1
= control target key start
LH: loop header
LB: loop body
LE: loop exit
PB: predicated region body
PF: predicated region fallthrough
CT: control target
= control target key end

     0   :  { %vm17_vm0 = vcmask 130048   ;;  %v107_v2 = vmov 0   ;;  %vm80_vm2 = vcmask 7168   ;;  %v108_v6 = vmov 0.0   ;;  %s165_s0 = inlined_call_operand.vmem [shape: f32[16,16], index: 0, kind: input, shape index: {}]   ;;  %s166_s1 = inlined_call_operand.vmem [shape: s32[16,1], index: 1, kind: input, shape index: {}]   ;;  %s167_s3 = inlined_call_operand.vmem [shape: f32[16,1], index: 3, kind: output, shape index: {1}]   ;;  %s168_s2 = inlined_call_operand.vmem [shape: f32[16,1], index: 2, kind: output, shape index: {0}]  }
   0x1   :  { %v13_v0 = vld [vmem:[%s165_s0] sm:$0xff]  ;;  %v14_v1 = vld [vmem:[%s165_s0 + $0x8] sm:$0xff]  ;;  %97 = vset.pattern.permute.xlu1 %v107_v2  ;;  %98 = vset.pattern.permute.xlu0 %v107_v2  ;;  %v40_v15 = vlaneseq }
   0x2   :  { %v15_v3 = vld [vmem:[%s166_s1] sm:$0xff]  ;;  %v18_v4 = vsel %vm17_vm0, %v13_v0, -inf  ;;  %v16_v5 = vld [vmem:[%s166_s1 + $0x8] sm:$0xff]  ;;  %v21_v8 = vsel %vm17_vm0, %v14_v1, -inf }
   0x3   :  { %43 = vperm.xlu1 %97, %v15_v3   ;;  %vm72_vm1 = vcmp.ne.s32.totalorder %v15_v3, 4294967295  ;;  %19 = vmax.xlane.f32.xlu0 %v18_v4  ;;  %vm73_vm3 = vcmp.ne.s32.totalorder %v16_v5, 4294967295  ;;  %v41_v17 = vand.u32 127, %v40_v15 }
   0x4   :  { %v93_v7 = vsel %vm72_vm1, 1.0, %v108_v6  ;;  %v94_v9 = vsel %vm73_vm3, 1.0, %v108_v6 }
   0x5   :  { %83 = vst.msk [vmem:[%s167_s3] sm:$0xff] %vm80_vm2, %v93_v7  ;;  %84 = vst.msk [vmem:[%s167_s3 + $0x8] sm:$0xff] %vm80_vm2, %v94_v9 }
   0x7   :  { %46 = vperm.xlu1 %97, %v16_v5   ;;  %22 = vmax.xlane.f32.xlu0 %v21_v8 }
  0x82   :  { %v44_v18 = vpop.permute.xlu1 %43 }
  0x83   :  { %vm48_vm4 = vcmp.eq.s32.totalorder %v41_v17, %v44_v18 }
  0x86   :  { %v47_v20 = vpop.permute.xlu1 %46 }
  0x87   :  { %vm49_vm5 = vcmp.eq.s32.totalorder %v41_v17, %v47_v20 }
  0x90   :  { %v20_v10 = vpop.xlane.xlu0 %19 }
  0x91   :  { %v24_v11 = vsub.f32 %v13_v0, %v20_v10 }
  0x93   :  { %v26_v12 = vmul.f32 1.442695, %v24_v11  ;;  %v50_v22 = vsel %vm48_vm4, %v24_v11, 0.0  ;;  %v58_v28 = vsel %vm17_vm0, %v24_v11, 0.0 }
  0x94   :  { %v23_v13 = vpop.xlane.xlu0 %22  ;;  %v52_v24 = vsel %vm17_vm0, %v50_v22, 0.0 }
  0x95   :  { %99 = vpow2.f32 %v26_v12  ;;  %v25_v14 = vsub.f32 %v14_v1, %v23_v13 }
  0x97   :  { %v28_v16 = vmul.f32 1.442695, %v25_v14  ;;  %v51_v26 = vsel %vm49_vm5, %v25_v14, 0.0  ;;  %v61_v29 = vsel %vm17_vm0, %v25_v14, 0.0 }
  0x98   :  { %v55_v27 = vsel %vm17_vm0, %v51_v26, 0.0 }
  0x99   :  { %101 = vpow2.f32 %v28_v16 }
  0x9f   :  { %v100_v19 = vpop.eup %99 }
  0xa0   :  { %v30_v21 = vsel %vm17_vm0, %v100_v19, 0.0 }
  0xa1   :  { %31 = vadd.xlane.f32.xlu0 %v30_v21 }
  0xa3   :  { %v102_v23 = vpop.eup %101 }
  0xa4   :  { %v33_v25 = vsel %vm17_vm0, %v102_v23, 0.0 }
  0xa5   :  { %53 = vadd.xlane.f32.xlu0 %v52_v24  ;;  %34 = vadd.xlane.f32.xlu1 %v33_v25 }
  0xa9   :  { %56 = vadd.xlane.f32.xlu0 %v55_v27 }
  0xad   :  { %59 = vadd.xlane.f32.xlu0 %v58_v28 }
  0xb1   :  { %62 = vadd.xlane.f32.xlu0 %v61_v29 }
 0x12e   :  { %v32_v30 = vpop.xlane.xlu0 %31 }
 0x12f   :  { %103 = vlog2.f32 %v32_v30 }
 0x132   :  { %v54_v31 = vpop.xlane.xlu0 %53  ;;  %v35_v32 = vpop.xlane.xlu1 %34 }
 0x133   :  { %105 = vlog2.f32 %v35_v32  ;;  %v64_v36 = vmul.f32 0.9, %v54_v31 }
 0x136   :  { %v57_v33 = vpop.xlane.xlu0 %56 }
 0x137   :  { %v65_v43 = vmul.f32 0.9, %v57_v33 }
 0x139   :  { %v104_v34 = vpop.eup %103 }
 0x13a   :  { %v60_v35 = vpop.xlane.xlu0 %59  ;;  %v37_v39 = vmul.f32 0.6931472, %v104_v34 }
 0x13b   :  { %v66_v37 = vmul.f32 0.00625, %v60_v35 }
 0x13d   :  { %v106_v38 = vpop.eup %105  ;;  %v68_v40 = vadd.f32 %v66_v37, %v64_v36 }
 0x13e   :  { %v63_v41 = vpop.xlane.xlu0 %62  ;;  %v39_v42 = vmul.f32 0.6931472, %v106_v38 }
 0x13f   :  { %v70_v44 = vsub.f32 %v37_v39, %v68_v40  ;;  %v67_v45 = vmul.f32 0.00625, %v63_v41 }
 0x141   :  { %v78_v46 = vmul.f32 %v93_v7, %v70_v44  ;;  %v69_v47 = vadd.f32 %v67_v45, %v65_v43 }
 0x143   :  { %81 = vst.msk [vmem:[%s168_s2] sm:$0xff] %vm80_vm2, %v78_v46  ;;  %v71_v48 = vsub.f32 %v39_v42, %v69_v47 }
 0x145   :  { %v79_v49 = vmul.f32 %v94_v9, %v71_v48 }
 0x147   :  { %82 = vst.msk [vmem:[%s168_s2 + $0x8] sm:$0xff] %vm80_vm2, %v79_v49 }

</bundles_post_ra>
